<compile_context>
chip_gen: v5e
topology: v5e:2x2
jax: 0.10.0
libtpu: 0.0.40
codegen_flags: <defaults>
</compile_context>

<pallas_src>
import functools

import jax
import jax.numpy as jnp
import numpy as np
from jax.experimental import pallas as pl
from jax.experimental.pallas import tpu as pltpu


def _round_up(x, m):
    return ((x + m - 1) // m) * m


def _vmem_capacity_bytes():
    """Physical VMEM per core (used to derive per-generation tile / VMEM budgets)."""
    try:
        info = pltpu.get_tpu_info()
        for attr in ("vmem_capacity_bytes", "vmem_size_bytes", "vmem_bytes"):
            v = getattr(info, attr, None)
            if v:
                return int(v)
    except Exception:
        pass
    return 64 * 1024 * 1024  # conservative default (v7x per-TensorCore)


def _bce_kernel(x_ref, t_ref, negw_ref, out_ref, *, class_axis, tile, n_valid,
                needs_mask):
    """One tile of softmax + weighted BCE; writes batch-reduced partial sums."""
    batch_axis = 1 - class_axis

    x = x_ref[...].astype(jnp.float32)
    t = t_ref[...].astype(jnp.float32)
    neg_w = negw_ref[...]                                # (1, C) or (C, 1), float32

    # log-softmax over the class axis; log(1-p) = log(sum_e - e) - log(sum_e)
    # keeps the transcendental count low and avoids materializing probs.
    m = jnp.max(x, axis=class_axis, keepdims=True)
    e = jnp.exp(x - m)
    s = jnp.sum(e, axis=class_axis, keepdims=True)
    log_s = jnp.log(s)
    log_p = jnp.maximum((x - m) - log_s, -100.0)                            # clamp(log p)
    log_q = jnp.maximum(jnp.log(jnp.maximum(s - e, 0.0)) - log_s, -100.0)   # clamp(log(1-p))

    # fused blend: t*log_p + (1-t)*log_q == log_q + t*(log_p - log_q)
    loss = neg_w * (log_q + t * (log_p - log_q))

    if needs_mask:
        # Ragged last tile: data past the end of the un-padded input is
        # unspecified; use a select so NaN/Inf there cannot reach the sum.
        idx = jax.lax.broadcasted_iota(jnp.int32, loss.shape, batch_axis)
        valid = (pl.program_id(0) * tile + idx) < n_valid
        loss = jnp.where(valid, loss, 0.0)

    # Small dense per-tile partial (reduced over the batch axis only).
    out_ref[...] = jnp.sum(loss, axis=batch_axis, keepdims=True)


def my_bce_loss(logits, target, class_weight, *, vmem_budget_bytes=None):
    """Pallas TPU implementation of MyBCELoss.forward.

    logits:       (N, C) float array
    target:       (N, C) float array with values in [0, 1]
    class_weight: length-C per-class weights
    returns:      scalar float32 loss (mean reduction)
    """
    n, c = logits.shape
    w = jnp.asarray(class_weight, dtype=jnp.float32).reshape(c)
    neg_w = -w

    vmem_cap = _vmem_capacity_bytes()
    if vmem_budget_bytes is None:
        vmem_budget_bytes = min(vmem_cap // 2, 64 * 1024 * 1024)
    vmem_limit = max(min(vmem_cap * 3 // 4, 96 * 1024 * 1024),
                     vmem_budget_bytes + 8 * 1024 * 1024)

    # Dtype-aware per-element input-buffer bytes (logits + target, double-buffered).
    it_in = jnp.dtype(logits.dtype).itemsize + jnp.dtype(target.dtype).itemsize

    use_transpose = c < 16

    if not use_transpose:
        # Natural (N, C) layout: class on lanes, batch tiled over a 1-D grid.
        w_phys = _round_up(c, 128)                       # VMEM lane padding
        bytes_per_row = w_phys * (2 * it_in + 6 * 4)     # 2x-buffered inputs + f32 temps
        tile = max(8, (vmem_budget_bytes // bytes_per_row) // 8 * 8)
        if tile >= n:
            tile = n                                     # single full-extent block
        class_axis = 1
        x, t = logits, target
        neg_w2 = neg_w.reshape(1, c)
        in_blk, w_blk = (tile, c), (1, c)
        in_map = lambda i: (i, 0)
        out_blk = (None, 1, c)
        out_dims = (1, c)
    else:
        # Tiny class count: one transpose pass (no pad) so the batch is lane-dense.
        c_phys = _round_up(c, 8)
        bytes_per_col = c_phys * (2 * it_in + 6 * 4)
        tile = max(128, (vmem_budget_bytes // bytes_per_col) // 128 * 128)
        if tile >= n:
            tile = n                                     # single full-extent block
        class_axis = 0
        x, t = logits.T, target.T                        # (C, N)
        neg_w2 = neg_w.reshape(c, 1)
        in_blk, w_blk = (c, tile), (c, 1)
        in_map = lambda i: (0, i)
        out_blk = (None, c, 1)
        out_dims = (c, 1)

    num_tiles = int(pl.cdiv(n, tile))
    needs_mask = (n % tile) != 0
    out_shape = jax.ShapeDtypeStruct((num_tiles,) + out_dims, jnp.float32)

    kernel = functools.partial(
        _bce_kernel, class_axis=class_axis, tile=tile, n_valid=n,
        needs_mask=needs_mask)

    in_bytes = int(x.size) * x.dtype.itemsize + int(t.size) * t.dtype.itemsize + c * 4
    out_bytes = num_tiles * out_dims[0] * out_dims[1] * 4
    cost = pl.CostEstimate(
        flops=int(10 * n * c),
        transcendentals=int(3 * n * c),
        bytes_accessed=int(in_bytes + out_bytes),
    )

    partials = pl.pallas_call(
        kernel,
        out_shape=out_shape,
        grid=(num_tiles,),
        in_specs=[
            pl.BlockSpec(in_blk, in_map),
            pl.BlockSpec(in_blk, in_map),
            pl.BlockSpec(w_blk, lambda i: (0, 0)),
        ],
        out_specs=pl.BlockSpec(out_blk, lambda i: (i, 0, 0)),
        compiler_params=pltpu.CompilerParams(
            dimension_semantics=("parallel",),
            vmem_limit_bytes=int(vmem_limit),
        ),
        cost_estimate=cost,
    )(x, t, neg_w2)

    # Tiny final reduction in the wrapper; divide by the TRUE element count.
    return jnp.sum(partials) / jnp.float32(n * c)


def _reference(logits, target, class_weight):
    """Pure-JAX mirror of the PyTorch module."""
    x = jnp.asarray(logits, jnp.float32)
    t = jnp.asarray(target, jnp.float32)
    w = jnp.asarray(class_weight, jnp.float32)[None, :]
    probs = jax.nn.softmax(x, axis=1)
    log_p = jnp.maximum(jnp.log(probs), -100.0)
    log_q = jnp.maximum(jnp.log(1.0 - probs), -100.0)
    return jnp.mean(-w * (t * log_p + (1.0 - t) * log_q))


if __name__ == "__main__":
    key = jax.random.PRNGKey(0)
    ks = jax.random.split(key, 8)

    # Case 1: tiny class count (C=4) -> transposed lane-dense path, single block.
    n1, c1 = 16, 4
    logits1 = jax.random.normal(ks[0], (n1, c1), dtype=jnp.float32)
    target1 = jax.random.uniform(ks[1], (n1, c1), dtype=jnp.float32)
    weight1 = [1.0, 2.0, 0.5, 1.5]
    out1 = jax.block_until_ready(my_bce_loss(logits1, target1, weight1))
    ref1 = jax.block_until_ready(_reference(logits1, target1, weight1))
    assert np.allclose(np.asarray(out1), np.asarray(ref1), rtol=1e-5, atol=1e-5), (out1, ref1)

    # Case 2: wide class axis (C=160) -> natural class-on-lanes path.
    n2, c2 = 24, 160
    logits2 = jax.random.normal(ks[2], (n2, c2), dtype=jnp.float32)
    target2 = jax.random.uniform(ks[3], (n2, c2), dtype=jnp.float32)
    weight2 = np.linspace(0.5, 1.5, c2).astype(np.float32)
    out2 = jax.block_until_ready(my_bce_loss(logits2, target2, weight2))
    ref2 = jax.block_until_ready(_reference(logits2, target2, weight2))
    assert np.allclose(np.asarray(out2), np.asarray(ref2), rtol=1e-5, atol=1e-5), (out2, ref2)

    # Case 3: bf16 inputs + small forced VMEM budget -> multi-tile grid with a
    # ragged, masked last tile on the natural path (dtype-aware tile sizing).
    n3, c3 = 260, 32
    logits3 = jax.random.normal(ks[4], (n3, c3), dtype=jnp.float32).astype(jnp.bfloat16)
    target3 = jax.random.uniform(ks[5], (n3, c3), dtype=jnp.float32).astype(jnp.bfloat16)
    weight3 = np.linspace(0.25, 2.0, c3).astype(np.float32)
    out3 = jax.block_until_ready(
        my_bce_loss(logits3, target3, weight3, vmem_budget_bytes=64 * 1024))
    ref3 = jax.block_until_ready(_reference(logits3, target3, weight3))
    assert np.allclose(np.asarray(out3), np.asarray(ref3), rtol=1e-5, atol=1e-5), (out3, ref3)

    # Case 4: tiny C with a multi-tile grid and ragged last tile on the
    # transposed path (mask over lanes).
    n4, c4 = 200, 4
    logits4 = jax.random.normal(ks[6], (n4, c4), dtype=jnp.float32)
    target4 = jax.random.uniform(ks[7], (n4, c4), dtype=jnp.float32)
    weight4 = [0.5, 1.0, 1.5, 2.0]
    out4 = jax.block_until_ready(
        my_bce_loss(logits4, target4, weight4, vmem_budget_bytes=64 * 1024))
    ref4 = jax.block_until_ready(_reference(logits4, target4, weight4))
    assert np.allclose(np.asarray(out4), np.asarray(ref4), rtol=1e-5, atol=1e-5), (out4, ref4)

    print("KERNEL_OK")
</pallas_src>

<mosaic_0001>
module attributes {stable_mosaic.version = 11 : i64} {
  func.func @_bce_kernel(%arg0: i32, %arg1: memref<4x16xf32, #tpu.memory_space<vmem>>, %arg2: memref<4x16xf32, #tpu.memory_space<vmem>>, %arg3: memref<4x1xf32, #tpu.memory_space<vmem>>, %arg4: memref<1x4x1xf32, #tpu.memory_space<vmem>>) attributes {dimension_semantics = [#tpu.dimension_semantics<parallel>], iteration_bounds = array<i64: 1>, scalar_prefetch = 0 : i64, scratch_operands = 0 : i64, tpu.core_type = #tpu.core_type<tc>, window_params = [{transform_indices = @transform_0, window_bounds = array<i64: 4, 16>}, {transform_indices = @transform_1, window_bounds = array<i64: 4, 16>}, {pipeline_mode = #tpu.pipeline_mode<synchronous>, transform_indices = @transform_2, window_bounds = array<i64: 4, 1>}, {transform_indices = @transform_3, window_bounds = array<i64: 1, 4, 1>}]} {
    %c0 = arith.constant 0 : index
    %c0_0 = arith.constant 0 : index
    %0 = vector.load %arg1[%c0, %c0_0] : memref<4x16xf32, #tpu.memory_space<vmem>>, vector<4x16xf32>
    %c0_1 = arith.constant 0 : index
    %c0_2 = arith.constant 0 : index
    %1 = vector.load %arg2[%c0_1, %c0_2] : memref<4x16xf32, #tpu.memory_space<vmem>>, vector<4x16xf32>
    %c0_3 = arith.constant 0 : index
    %c0_4 = arith.constant 0 : index
    %2 = vector.load %arg3[%c0_3, %c0_4] : memref<4x1xf32, #tpu.memory_space<vmem>>, vector<4x1xf32>
    %cst = arith.constant dense<0xFF800000> : vector<16xf32>
    %3 = vector.multi_reduction <maximumf>, %0, %cst [0] : vector<4x16xf32> to vector<16xf32>
    %4 = vector.shape_cast %3 : vector<16xf32> to vector<1x16xf32>
    %5 = vector.broadcast %4 : vector<1x16xf32> to vector<4x16xf32>
    %6 = arith.subf %0, %5 : vector<4x16xf32>
    %7 = math.exp %6 : vector<4x16xf32>
    %cst_5 = arith.constant dense<0.000000e+00> : vector<16xf32>
    %8 = vector.multi_reduction <add>, %7, %cst_5 [0] : vector<4x16xf32> to vector<16xf32>
    %9 = vector.shape_cast %8 : vector<16xf32> to vector<1x16xf32>
    %10 = math.log %9 : vector<1x16xf32>
    %11 = vector.broadcast %4 : vector<1x16xf32> to vector<4x16xf32>
    %12 = arith.subf %0, %11 : vector<4x16xf32>
    %13 = vector.broadcast %10 : vector<1x16xf32> to vector<4x16xf32>
    %14 = arith.subf %12, %13 : vector<4x16xf32>
    %cst_6 = arith.constant -1.000000e+02 : f32
    %15 = vector.broadcast %cst_6 : f32 to vector<4x16xf32>
    %16 = arith.maximumf %14, %15 : vector<4x16xf32>
    %17 = vector.broadcast %9 : vector<1x16xf32> to vector<4x16xf32>
    %18 = arith.subf %17, %7 : vector<4x16xf32>
    %cst_7 = arith.constant 0.000000e+00 : f32
    %19 = vector.broadcast %cst_7 : f32 to vector<4x16xf32>
    %20 = arith.maximumf %18, %19 : vector<4x16xf32>
    %21 = math.log %20 : vector<4x16xf32>
    %22 = vector.broadcast %10 : vector<1x16xf32> to vector<4x16xf32>
    %23 = arith.subf %21, %22 : vector<4x16xf32>
    %cst_8 = arith.constant -1.000000e+02 : f32
    %24 = vector.broadcast %cst_8 : f32 to vector<4x16xf32>
    %25 = arith.maximumf %23, %24 : vector<4x16xf32>
    %26 = arith.subf %16, %25 : vector<4x16xf32>
    %27 = arith.mulf %1, %26 : vector<4x16xf32>
    %28 = arith.addf %25, %27 : vector<4x16xf32>
    %29 = vector.broadcast %2 : vector<4x1xf32> to vector<4x16xf32>
    %30 = arith.mulf %29, %28 : vector<4x16xf32>
    %cst_9 = arith.constant dense<0.000000e+00> : vector<4xf32>
    %31 = vector.multi_reduction <add>, %30, %cst_9 [1] : vector<4x16xf32> to vector<4xf32>
    %32 = vector.shape_cast %31 : vector<4xf32> to vector<4x1xf32>
    %c0_10 = arith.constant 0 : index
    %c0_11 = arith.constant 0 : index
    %c0_12 = arith.constant 0 : index
    %33 = vector.load %arg4[%c0_10, %c0_11, %c0_12] : memref<1x4x1xf32, #tpu.memory_space<vmem>>, vector<1x4x1xf32>
    %34 = vector.shape_cast %33 : vector<1x4x1xf32> to vector<4x1xf32>
    %35 = vector.shape_cast %32 : vector<4x1xf32> to vector<1x4x1xf32>
    tpu.vector_store %arg4[%c0_10, %c0_11, %c0_12], %35 {strides = array<i32>} : memref<1x4x1xf32, #tpu.memory_space<vmem>>, vector<1x4x1xf32>,
    return
  }
  func.func @transform_0(%arg0: i32) -> (i32, i32) {
    %c0_i32 = arith.constant 0 : i32
    %c0_i32_0 = arith.constant 0 : i32
    return %c0_i32, %arg0 : i32, i32
  }
  func.func @transform_1(%arg0: i32) -> (i32, i32) {
    %c0_i32 = arith.constant 0 : i32
    %c0_i32_0 = arith.constant 0 : i32
    return %c0_i32, %arg0 : i32, i32
  }
  func.func @transform_2(%arg0: i32) -> (i32, i32) {
    %c0_i32 = arith.constant 0 : i32
    %c0_i32_0 = arith.constant 0 : i32
    %c0_i32_1 = arith.constant 0 : i32
    return %c0_i32, %c0_i32_0 : i32, i32
  }
  func.func @transform_3(%arg0: i32) -> (i32, i32, i32) {
    %c0_i32 = arith.constant 0 : i32
    %c0_i32_0 = arith.constant 0 : i32
    %c0_i32_1 = arith.constant 0 : i32
    return %arg0, %c0_i32, %c0_i32_0 : i32, i32, i32
  }
}

</mosaic_0001>

<bundles_post_ra>
// kernel: tpu_custom_call.1
= control target key start
LH: loop header
LB: loop body
LE: loop exit
PB: predicated region body
PF: predicated region fallthrough
CT: control target
= control target key end

     0   :  { %8 = vsyncpa [#allocation3], 0  ;;  %s113_s15 = smov [#allocation2]   ;;  %s150_s0 = inlined_call_operand.vmem [shape: f32[4,16], index: 0, kind: input, shape index: {}]   ;;  %s151_s1 = inlined_call_operand.hbm [shape: f32[4,16], index: 1, kind: input, shape index: {}]   ;;  %s152_s2 = inlined_call_operand.vmem [shape: f32[4,1], index: 2, kind: input, shape index: {}]   ;;  %s153_s3 = inlined_call_operand.vmem [shape: f32[1,4,1], index: 3, kind: output, shape index: {}]  }
   0x1   :  { %s16_s14 = sshll.u32 %s151_s1, 4  ;;  %s18_s16 = sshll.u32 %s113_s15, 4  ;;  %s17_s14 = int_to_ptr.hbm [resolvable:$true] %s16_s14  ;;  %s19_s16 = int_to_ptr.vmem [resolvable:$true] %s18_s16 }
   0x2   :  { %21 = dma.hbm_to_vmem [thread:$0]  %s17_s14, 64, %s19_s16, [#allocation3]  }
   0x3   :  { %111 = dma.done.wait [#allocation3], 64  }
   0x4   :  { %112 = vsyncadd [#allocation3], 4294967232  ;;  %v114_v0 = vmov 0   ;;  %v30_v1 = vld [vmem:[%s152_s2] sm:$0xf]  ;;  %vm31_vm0 = vcmask 125952  }
   0x5   :  { %80 = vset.pattern.permute.xlu0 %v114_v0  ;;  %v28_v2 = vld [vmem:[%s150_s0] sm:$0xf]  ;;  %vm71_vm1 = vcmask 3072  }
   0x6   :  { %64 = vperm.xlu0 %80, %v30_v1   ;;  %v32_v3 = vsel %vm31_vm0, %v28_v2, -inf  ;;  %v29_v31 = vld [vmem:[#allocation2] sm:$0xf] }
   0x7   :  { %v33_v4 = vrot.slane %v32_v3, 4 }
   0x9   :  { %v34_v5 = vmax.f32 %v32_v3, %v33_v4 }
   0xb   :  { %v35_v6 = vrot.slane %v34_v5, 2 }
   0xd   :  { %v36_v7 = vmax.f32 %v34_v5, %v35_v6 }
   0xf   :  { %v37_v8 = vrot.slane %v36_v7, 1 }
  0x11   :  { %v38_v9 = vmax.f32 %v36_v7, %v37_v8 }
  0x13   :  { %v39_v10 = vsub.f32 %v28_v2, %v38_v9 }
  0x15   :  { %v40_v11 = vmul.f32 1.442695, %v39_v10 }
  0x17   :  { %81 = vpow2.f32 %v40_v11 }
  0x1d   :  { %v82_v12 = vpop.eup %81 }
  0x1e   :  { %v42_v13 = vsel %vm31_vm0, %v82_v12, 0.0 }
  0x1f   :  { %v43_v14 = vrot.slane %v42_v13, 4 }
  0x21   :  { %v44_v15 = vadd.f32 %v43_v14, %v42_v13 }
  0x23   :  { %v45_v16 = vrot.slane %v44_v15, 2 }
  0x25   :  { %v46_v17 = vadd.f32 %v45_v16, %v44_v15 }
  0x27   :  { %v47_v18 = vrot.slane %v46_v17, 1 }
  0x29   :  { %v48_v19 = vadd.f32 %v47_v18, %v46_v17 }
  0x2b   :  { %v53_v20 = vsub.f32 %v48_v19, %v82_v12  ;;  %83 = vlog2.f32 %v48_v19 }
  0x2d   :  { %v54_v21 = vmax.f32 %v53_v20, 0.0 }
  0x2f   :  { %85 = vlog2.f32 %v54_v21 }
  0x31   :  { %v84_v22 = vpop.eup %83 }
  0x32   :  { %v50_v24 = vmul.f32 0.6931472, %v84_v22 }
  0x34   :  { %v51_v26 = vsub.f32 %v39_v10, %v50_v24 }
  0x35   :  { %v86_v23 = vpop.eup %85 }
  0x36   :  { %v56_v25 = vmul.f32 0.6931472, %v86_v23  ;;  %v52_v28 = vmax.f32 %v51_v26, -100.0 }
  0x38   :  { %v57_v27 = vsub.f32 %v56_v25, %v50_v24 }
  0x3a   :  { %v58_v29 = vmax.f32 %v57_v27, -100.0 }
  0x3c   :  { %v59_v30 = vsub.f32 %v52_v28, %v58_v29 }
  0x3e   :  { %v60_v32 = vmul.f32 %v59_v30, %v29_v31 }
  0x40   :  { %v61_v33 = vadd.f32 %v60_v32, %v58_v29 }
  0x78   :  { %v65_v34 = vpop.permute.xlu0 %64 }
  0x79   :  { %v67_v35 = vmul.f32 %v65_v34, %v61_v33 }
  0x7b   :  { %v68_v36 = vsel %vm31_vm0, %v67_v35, 0.0 }
  0x7c   :  { %69 = vadd.xlane.f32.xlu0 %v68_v36 }
  0xef   :  { %v70_v37 = vpop.xlane.xlu0 %69 }
  0xf0   :  { %72 = vst.msk [vmem:[%s153_s3] sm:$0xf] %vm71_vm1, %v70_v37 }
  0xf1   :  { %77 = vsyncpa [#allocation3], 1 }

</bundles_post_ra>
